<compile_context>
chip_gen: v7x
topology: tpu7x:2x2x1
jax: 0.10.0
libtpu: 0.0.40
codegen_flags: <defaults>
</compile_context>

<pallas_src>
import functools

import jax
import jax.numpy as jnp
from jax.experimental import pallas as pl
from jax.experimental.pallas import tpu as pltpu


def _make_kernel(th, kh, stride):
    """One grid step computes the whole output image of one batch element.

    x_ref: (1, H_pad, K_pad)        bf16  (padded image, lane-padded to 128,
                                           bias lane = 1.0 at column wc_in)
    w_ref: (KH, K_pad, W_out*C_out) bf16  (banded weights; BN scale folded in,
                                           BN shift in tap-0 bias-lane row)
    o_ref: (1, H_out, W_out*C_out)  f32
    """

    def kernel(x_ref, w_ref, o_ref):
        acc = None
        for i in range(kh):                       # KH static-slice matmuls, K = 128
            if stride == 1:
                rows = x_ref[0, i:i + th, :]      # compile-time view
            else:
                # TODO(synk): stride>1 path untested (value-level strided slice).
                rows = x_ref[0, i:i + (th - 1) * stride + 1, :][::stride]
            part = jnp.dot(rows, w_ref[i], preferred_element_type=jnp.float32)
            acc = part if acc is None else acc + part
        o_ref[0] = jnp.maximum(acc, 0.0).astype(o_ref.dtype)   # ReLU, dense store

    return kernel


@functools.partial(jax.jit, static_argnames=("stride", "padding"))
def conv_bn_relu_qat(x_nchw, weight, gamma, beta, running_mean, running_var,
                     *, stride=1, padding=0, eps=1e-5):
    """Forward of ConvBNReLUQAT.  x_nchw: (N, C_in, H, W) f32.
    weight: (C_out, C_in, KH, KW) f32 (PyTorch conv layout, bias=False)."""
    n, c_in, h, w = x_nchw.shape
    c_out, _, kh, kw = weight.shape
    h_out = (h + 2 * padding - kh) // stride + 1
    w_out = (w + 2 * padding - kw) // stride + 1
    h_pad = h + 2 * padding
    w_pad = w + 2 * padding
    wc_in = w_pad * c_in                    # valid input lanes
    wc_out = w_out * c_out                  # output lane axis (128 for the test)
    # Pad K to a multiple of 128, with one extra lane reserved for the BN-shift bias.
    k_pad = ((wc_in + 1 + 127) // 128) * 128

    # ---- BN folding (eval-mode running stats) ----
    inv_std = gamma / jnp.sqrt(running_var + eps)            # (C_out,)
    shift = beta - running_mean * inv_std                    # (C_out,)

    # ---- input: NCHW -> lane-dense (N, H_pad, K_pad), bf16, bias lane = 1 ----
    x_nhwc = jnp.transpose(x_nchw, (0, 2, 3, 1))
    x_padded = jnp.pad(
        x_nhwc, ((0, 0), (padding, padding), (padding, padding), (0, 0)))
    x_flat = x_padded.reshape(n, h_pad, wc_in)
    x_flat = jnp.pad(x_flat, ((0, 0), (0, 0), (0, k_pad - wc_in)))
    x_flat = x_flat.at[:, :, wc_in].set(1.0)                 # constant bias lane
    x_flat = x_flat.astype(jnp.bfloat16)

    # ---- weights: fold BN scale, scatter into the banded (Toeplitz) matrix ----
    w_hwio = jnp.transpose(weight, (2, 3, 1, 0)) * inv_std[None, None, None, :]
    hh = jnp.arange(kh).reshape(kh, 1, 1, 1, 1)
    oww = jnp.arange(w_out).reshape(1, w_out, 1, 1, 1)
    jj = jnp.arange(kw).reshape(1, 1, kw, 1, 1)
    cii = jnp.arange(c_in).reshape(1, 1, 1, c_in, 1)
    coo = jnp.arange(c_out).reshape(1, 1, 1, 1, c_out)
    k_idx = (oww * stride + jj) * c_in + cii                 # input lane per tap
    n_idx = oww * c_out + coo                                # output lane
    vals = jnp.broadcast_to(w_hwio[:, None, :, :, :],
                            (kh, w_out, kw, c_in, c_out))
    w_band = jnp.zeros((kh, k_pad, wc_out), jnp.float32)
    w_band = w_band.at[hh, k_idx, n_idx].add(vals)
    # BN shift enters via the bias lane (applied exactly once: tap 0 only).
    w_band = w_band.at[0, wc_in, :].set(jnp.tile(shift, w_out))
    w_band = w_band.astype(jnp.bfloat16)

    kernel = _make_kernel(h_out, kh, stride)

    out_flat = pl.pallas_call(
        kernel,
        out_shape=jax.ShapeDtypeStruct((n, h_out, wc_out), jnp.float32),
        grid_spec=pltpu.PrefetchScalarGridSpec(
            num_scalar_prefetch=0,
            grid=(n,),                              # batch only; "parallel" for v7x 2-TC
            in_specs=[
                # whole padded image of batch b (tiny: 18 x 128 bf16 ≈ 4.5 KiB)
                pl.BlockSpec((1, h_pad, k_pad), lambda b: (b, 0, 0)),
                # banded weights: constant across the grid (~96 KiB bf16)
                pl.BlockSpec((kh, k_pad, wc_out), lambda b: (0, 0, 0)),
            ],
            out_specs=pl.BlockSpec((1, h_out, wc_out), lambda b: (b, 0, 0)),
        ),
        compiler_params=pltpu.CompilerParams(
            dimension_semantics=("parallel",)),
    )(x_flat, w_band)

    # QuantStub / DeQuantStub are identity in the eager (un-converted) module.
    out = out_flat.reshape(n, h_out, w_out, c_out)
    return jnp.transpose(out, (0, 3, 1, 2))                  # N, C_out, H_out, W_out


def _reference(x_nchw, weight, gamma, beta, running_mean, running_var,
               *, stride, padding, eps=1e-5):
    y = jax.lax.conv_general_dilated(
        x_nchw, weight,
        window_strides=(stride, stride),
        padding=[(padding, padding), (padding, padding)],
        dimension_numbers=("NCHW", "OIHW", "NCHW"))
    scale = (gamma / jnp.sqrt(running_var + eps)).reshape(1, -1, 1, 1)
    shift = (beta - running_mean * gamma / jnp.sqrt(running_var + eps)
             ).reshape(1, -1, 1, 1)
    return jnp.maximum(y * scale + shift, 0.0)


if __name__ == "__main__":
    # Module config: ConvBNReLUQAT(in_channels=4, out_channels=8,
    #                              kernel_size=3, stride=1, padding=1, bias=False)
    N, C_IN, H, W = 2, 4, 16, 16
    C_OUT, K, STRIDE, PAD = 8, 3, 1, 1

    key = jax.random.PRNGKey(0)
    kx, kw_, kg, kb, km, kv = jax.random.split(key, 6)

    x = jax.random.normal(kx, (N, C_IN, H, W), jnp.float32)
    weight = jax.random.normal(kw_, (C_OUT, C_IN, K, K), jnp.float32) * 0.1
    gamma = 1.0 + 0.1 * jax.random.normal(kg, (C_OUT,), jnp.float32)
    beta = 0.1 * jax.random.normal(kb, (C_OUT,), jnp.float32)
    running_mean = 0.1 * jax.random.normal(km, (C_OUT,), jnp.float32)
    running_var = jnp.abs(1.0 + 0.1 * jax.random.normal(kv, (C_OUT,), jnp.float32))

    out = conv_bn_relu_qat(x, weight, gamma, beta, running_mean, running_var,
                           stride=STRIDE, padding=PAD)
    out = jax.block_until_ready(out)

    ref = _reference(x, weight, gamma, beta, running_mean, running_var,
                     stride=STRIDE, padding=PAD)
    assert out.shape == (N, C_OUT, H, W)
    # bf16 MXU inputs (incl. folded BN scale/shift) with f32 accumulation.
    assert jnp.allclose(out, ref, atol=5e-2, rtol=5e-2), "mismatch vs reference"
    print("KERNEL_OK")
</pallas_src>

<mosaic_0001>
module attributes {stable_mosaic.version = 11 : i64} {
  func.func private @main(%arg0: i32) attributes {dimension_semantics = [#tpu.dimension_semantics<core_parallel>], iteration_bounds = array<i64: 2>, tpu.core_type = #tpu.core_type<sc_scalar_subcore>, window_params = []} {
    return
  }
}

module attributes {stable_mosaic.version = 11 : i64} {
  func.func private @main(%arg0: i32) attributes {dimension_semantics = [#tpu.dimension_semantics<core_parallel>], iteration_bounds = array<i64: 2>, tpu.core_type = #tpu.core_type<sc_scalar_subcore>, window_params = []} {
    return
  }
}

module attributes {stable_mosaic.version = 11 : i64} {
  func.func @kernel(%arg0: i32, %arg1: memref<1x18x128xbf16, #tpu.memory_space<vmem>>, %arg2: memref<3x128x128xbf16, #tpu.memory_space<vmem>>, %arg3: memref<1x16x128xf32, #tpu.memory_space<vmem>>) attributes {dimension_semantics = [#tpu.dimension_semantics<parallel>], iteration_bounds = array<i64: 2>, scalar_prefetch = 0 : i64, scratch_operands = 0 : i64, tpu.core_type = #tpu.core_type<tc>, window_params = [{transform_indices = @transform_0, window_bounds = array<i64: 1, 18, 128>}, {pipeline_mode = #tpu.pipeline_mode<synchronous>, transform_indices = @transform_1, window_bounds = array<i64: 3, 128, 128>}, {transform_indices = @transform_2, window_bounds = array<i64: 1, 16, 128>}]} {
    %c0 = arith.constant 0 : index
    %c0_0 = arith.constant 0 : index
    %c0_1 = arith.constant 0 : index
    %0 = vector.load %arg1[%c0, %c0_0, %c0_1] : memref<1x18x128xbf16, #tpu.memory_space<vmem>>, vector<1x16x128xbf16>
    %1 = vector.shape_cast %0 : vector<1x16x128xbf16> to vector<16x128xbf16>
    %c0_2 = arith.constant 0 : index
    %c0_3 = arith.constant 0 : index
    %c0_4 = arith.constant 0 : index
    %2 = vector.load %arg2[%c0_2, %c0_3, %c0_4] : memref<3x128x128xbf16, #tpu.memory_space<vmem>>, vector<1x128x128xbf16>
    %3 = vector.shape_cast %2 : vector<1x128x128xbf16> to vector<128x128xbf16>
    %cst = arith.constant dense<0.000000e+00> : vector<16x128xf32>
    %4 = tpu.matmul %1, %3, %cst {dimension_numbers = #tpu.dot_dimension_numbers<[1], [0], [0], [1], [0, 0, 1, 1], [], []>} : vector<16x128xbf16>, vector<128x128xbf16>, vector<16x128xf32> -> vector<16x128xf32>
    %c0_5 = arith.constant 0 : index
    %c1 = arith.constant 1 : index
    %c0_6 = arith.constant 0 : index
    %5 = vector.load %arg1[%c0_5, %c1, %c0_6] : memref<1x18x128xbf16, #tpu.memory_space<vmem>>, vector<1x16x128xbf16>
    %6 = vector.shape_cast %5 : vector<1x16x128xbf16> to vector<16x128xbf16>
    %c1_7 = arith.constant 1 : index
    %c0_8 = arith.constant 0 : index
    %c0_9 = arith.constant 0 : index
    %7 = vector.load %arg2[%c1_7, %c0_8, %c0_9] : memref<3x128x128xbf16, #tpu.memory_space<vmem>>, vector<1x128x128xbf16>
    %8 = vector.shape_cast %7 : vector<1x128x128xbf16> to vector<128x128xbf16>
    %cst_10 = arith.constant dense<0.000000e+00> : vector<16x128xf32>
    %9 = tpu.matmul %6, %8, %cst_10 {dimension_numbers = #tpu.dot_dimension_numbers<[1], [0], [0], [1], [0, 0, 1, 1], [], []>} : vector<16x128xbf16>, vector<128x128xbf16>, vector<16x128xf32> -> vector<16x128xf32>
    %10 = arith.addf %4, %9 : vector<16x128xf32>
    %c0_11 = arith.constant 0 : index
    %c2 = arith.constant 2 : index
    %c0_12 = arith.constant 0 : index
    %11 = vector.load %arg1[%c0_11, %c2, %c0_12] : memref<1x18x128xbf16, #tpu.memory_space<vmem>>, vector<1x16x128xbf16>
    %12 = vector.shape_cast %11 : vector<1x16x128xbf16> to vector<16x128xbf16>
    %c2_13 = arith.constant 2 : index
    %c0_14 = arith.constant 0 : index
    %c0_15 = arith.constant 0 : index
    %13 = vector.load %arg2[%c2_13, %c0_14, %c0_15] : memref<3x128x128xbf16, #tpu.memory_space<vmem>>, vector<1x128x128xbf16>
    %14 = vector.shape_cast %13 : vector<1x128x128xbf16> to vector<128x128xbf16>
    %cst_16 = arith.constant dense<0.000000e+00> : vector<16x128xf32>
    %15 = tpu.matmul %12, %14, %cst_16 {dimension_numbers = #tpu.dot_dimension_numbers<[1], [0], [0], [1], [0, 0, 1, 1], [], []>} : vector<16x128xbf16>, vector<128x128xbf16>, vector<16x128xf32> -> vector<16x128xf32>
    %16 = arith.addf %10, %15 : vector<16x128xf32>
    %cst_17 = arith.constant 0.000000e+00 : f32
    %17 = vector.broadcast %cst_17 : f32 to vector<16x128xf32>
    %18 = arith.maximumf %16, %17 : vector<16x128xf32>
    %c0_18 = arith.constant 0 : index
    %c0_19 = arith.constant 0 : index
    %c0_20 = arith.constant 0 : index
    %19 = vector.load %arg3[%c0_18, %c0_19, %c0_20] : memref<1x16x128xf32, #tpu.memory_space<vmem>>, vector<1x16x128xf32>
    %20 = vector.shape_cast %19 : vector<1x16x128xf32> to vector<16x128xf32>
    %21 = vector.shape_cast %18 : vector<16x128xf32> to vector<1x16x128xf32>
    tpu.vector_store %arg3[%c0_18, %c0_19, %c0_20], %21 {strides = array<i32>} : memref<1x16x128xf32, #tpu.memory_space<vmem>>, vector<1x16x128xf32>,
    return
  }
  func.func @transform_0(%arg0: i32) -> (i32, i32, i32) {
    %c0_i32 = arith.constant 0 : i32
    %c0_i32_0 = arith.constant 0 : i32
    %c0_i32_1 = arith.constant 0 : i32
    return %arg0, %c0_i32, %c0_i32_0 : i32, i32, i32
  }
  func.func @transform_1(%arg0: i32) -> (i32, i32, i32) {
    %c0_i32 = arith.constant 0 : i32
    %c0_i32_0 = arith.constant 0 : i32
    %c0_i32_1 = arith.constant 0 : i32
    %c0_i32_2 = arith.constant 0 : i32
    return %c0_i32, %c0_i32_0, %c0_i32_1 : i32, i32, i32
  }
  func.func @transform_2(%arg0: i32) -> (i32, i32, i32) {
    %c0_i32 = arith.constant 0 : i32
    %c0_i32_0 = arith.constant 0 : i32
    %c0_i32_1 = arith.constant 0 : i32
    return %arg0, %c0_i32, %c0_i32_0 : i32, i32, i32
  }
}

</mosaic_0001>

<bundles_post_ra>
// kernel: tile.8
= control target key start
LH: loop header
LB: loop body
LE: loop exit
PB: predicated region body
PF: predicated region fallthrough
CT: control target
= control target key end

     0   :  { %s28_s0 = inlined_call_operand.vmem [shape: f32[8], index: 0, kind: input, shape index: {}]   ;;  %s29_s1 = inlined_call_operand.vmem [shape: f32[16,8], index: 1, kind: output, shape index: {}]  }
   0x1   :  { %v4_v0 = vld [vmem:[%s28_s0] ss:$0 sm:$0xff] }
   0x2   :  { %5 = vst [vmem:[%s29_s1] sm:$0xff] %v4_v0  ;;  %8 = vst [vmem:[%s29_s1 + $0x8] sm:$0xff] %v4_v0 }

// kernel: conv_bn_relu_qat.1
= control target key start
LH: loop header
LB: loop body
LE: loop exit
PB: predicated region body
PF: predicated region fallthrough
CT: control target
= control target key end

     0   :  { %s784_s9 = smov 0   ;;  %s913_s0 = inlined_call_operand.vmem [shape: bf16[2,18,128], index: 0, kind: input, shape index: {}]   ;;  %s914_s1 = inlined_call_operand.vmem [shape: bf16[3,128,128], index: 1, kind: input, shape index: {}]   ;;  %s915_s2 = inlined_call_operand.vmem [shape: f32[2,16,128], index: 2, kind: output, shape index: {}]  }
   0x1 LB: > { %s558_s10 = sadd.s32 4294967295, %s765_s9   ;;  %p562_p0 = scmp.ge.s32.totalorder %s765_s9, 1  ;;  %s765_s9 = sphi %s784_s9, %s12_s9  }
   0x2   : > { %p112_p1 = scmp.lt.s32.totalorder %s765_s9, 3 }
   0x4   : > { %p113_p2 = pnand %p562_p0, %p112_p1 }
   0x5   : > { %v732_v0 = vld [vmem:[%s914_s1] sm:$0xff] (!%p113_p2)   ;;  %v767_v1 = vmov (!%p113_p2), 0.0   ;;  %v733_v2 = vld [vmem:[%s914_s1 + $0x8] sm:$0xff] (!%p113_p2)   ;;  %vm768_vm0 = vmmov (!%p113_p2), 0   ;;  %p134_p3 = scmp.lt.s32.totalorder (!%p113_p2), %s558_s10, 1  ;;  %v734_v3 = vld [vmem:[%s914_s1 + $0x10] sm:$0xff] (!%p113_p2)  }
   0x6   : > { %116 = sbr.rel (%p113_p2) target bundleno = 289 (0x121), region = 28  ;;  %675 = vmatprep.subr.bf16.mxu0 (!%p113_p2), %v767_v1  ;;  %655 = vmatprep.subr.bf16.mxu1 (!%p113_p2), %v767_v1  ;;  %v740_v4 = vld [vmem:[%s914_s1 + $0x40] sm:$0xff] (!%p113_p2)   ;;  %v735_v5 = vld [vmem:[%s914_s1 + $0x18] sm:$0xff] (!%p113_p2)   ;;  %v744_v6 = vld [vmem:[%s914_s1 + $0x48] sm:$0xff] (!%p113_p2)   ;;  %vm189_vm1 = vsmask.f32 (!%p113_p2), 7424 }
   0x7   : > { %676 = vmatpush3.bf16.msra.mxu0 (!%p113_p2), %v732_v0  ;;  %691 = vmatprep.mubr.msk.bf16.mxu0 (!%p113_p2), %vm768_vm0, %v767_v1  ;;  %v736_v7 = vld [vmem:[%s914_s1 + $0x20] sm:$0xff] (!%p113_p2)   ;;  %v746_v8 = vld [vmem:[%s914_s1 + $0x50] sm:$0xff] (!%p113_p2)   ;;  %v737_v9 = vld [vmem:[%s914_s1 + $0x28] sm:$0xff] (!%p113_p2)   ;;  %vm403_vm2 = vcmask (!%p113_p2), 1046528  }
   0x8   : > { %677 = vmatprep.subr.bf16.mxu0 (!%p113_p2), %v767_v1  ;;  %671 = vmatprep.mubr.msk.bf16.mxu1 (!%p113_p2), %vm768_vm0, %v767_v1  ;;  %v748_v10 = vld [vmem:[%s914_s1 + $0x58] sm:$0xff] (!%p113_p2)   ;;  %v738_v11 = vld [vmem:[%s914_s1 + $0x30] sm:$0xff] (!%p113_p2)   ;;  %v750_v14 = vld [vmem:[%s914_s1 + $0x60] sm:$0xff] (!%p113_p2)  }
   0x9   : > { %656 = vmatpush3.bf16.msra.mxu1 (!%p113_p2), %v740_v4  ;;  %v739_v16 = vld [vmem:[%s914_s1 + $0x38] sm:$0xff] (!%p113_p2)   ;;  %v752_v18 = vld [vmem:[%s914_s1 + $0x68] sm:$0xff] (!%p113_p2)   ;;  %v743_v20 = vld [vmem:[%s914_s1 + $0x80] sm:$0xff] (!%p113_p2)  }
   0xa   : > { %657 = vmatprep.subr.bf16.mxu1 (!%p113_p2), %v767_v1  ;;  %v754_v21 = vld [vmem:[%s914_s1 + $0x70] sm:$0xff] (!%p113_p2)   ;;  %v745_v25 = vld [vmem:[%s914_s1 + $0x88] sm:$0xff] (!%p113_p2)   ;;  %v756_v26 = vld [vmem:[%s914_s1 + $0x78] sm:$0xff] (!%p113_p2)  }
   0xb   : > { %678 = vmatpush3.bf16.msra.mxu0 (!%p113_p2), %v733_v2  ;;  %v747_v29 = vld [vmem:[%s914_s1 + $0x90] sm:$0xff] (!%p113_p2)   ;;  %v749_v31 = vld [vmem:[%s914_s1 + $0x98] sm:$0xff] (!%p113_p2)   ;;  %v751_v32 = vld [vmem:[%s914_s1 + $0xa0] sm:$0xff] (!%p113_p2)  }
   0xc   : > { %679 = vmatprep.subr.bf16.mxu0 (!%p113_p2), %v767_v1  ;;  %v753_v33 = vld [vmem:[%s914_s1 + $0xa8] sm:$0xff] (!%p113_p2)   ;;  %v755_v36 = vld [vmem:[%s914_s1 + $0xb0] sm:$0xff] (!%p113_p2)   ;;  %v758_v38 = vld [vmem:[%s914_s1 + $0xb8] sm:$0xff] (!%p113_p2)  }
   0xd   : > { %s917_s10 = smov (!%p134_p3, %s558_s10), 1  ;;  %658 = vmatpush3.bf16.msra.mxu1 %v744_v6 }
   0xe   : > { %s721_s25 = smul.u32 12, %s917_s10  ;;  %659 = vmatprep.subr.bf16.mxu1 %v767_v1 }
   0xf   : > { %680 = vmatpush3.bf16.msra.mxu0 %v734_v3 }
  0x10   : > { %681 = vmatprep.subr.bf16.mxu0 %v767_v1  ;;  %s837_s4 = scalar_lea.vmem %s913_s0, %s721_s25 }
  0x11   : > { %660 = vmatpush3.bf16.msra.mxu1 %v746_v8  ;;  %v145_v12 = vld [vmem:[%s837_s4] sm:$0xf]  ;;  %v146_v13 = vld [vmem:[%s837_s4 + $0x4] sm:$0xf] }
  0x12   : > { %661 = vmatprep.subr.bf16.mxu1 %v767_v1  ;;  %v582_v15 = vcombine.low %v145_v12, %v146_v13  ;;  %v757_v19 = vld [vmem:[%s837_s4 + $0x8] ss:$0 sps:$4 sm:$0x11]   ;;  %v382_v34 = vld [vmem:[%s837_s4] sm:$0xe]  ;;  %s627_s4 = sshll.u32 %s917_s10, 4 }
  0x13   : > { %682 = vmatpush3.bf16.msra.mxu0 %v735_v5  ;;  %v198_v24 = vshll.u32 %v757_v19, 16  ;;  %v616_v35 = vcombine.low %v382_v34, %v146_v13  ;;  %v405_v39 = vrot.slane %v757_v19, 1  ;;  %s143_s14 = scalar_lea.vmem %s915_s2, %s627_s4 }
  0x14   : > { %683 = vmatprep.subr.bf16.mxu0 %v767_v1  ;;  %v193_v17 = vshll.u32 %v582_v15, 16  ;;  %v191_v22 = vshrl.u32 %v582_v15, 16 }
  0x15   : > { %662 = vmatpush3.bf16.msra.mxu1 %v748_v10  ;;  %v200_v28 = vrot.slane %v198_v24, 1  ;;  %v404_v37 = vrot.slane %v616_v35, 1 }
  0x16   : > { %663 = vmatprep.subr.bf16.mxu1 %v767_v1  ;;  %v195_v23 = vrot.slane %v193_v17, 1 }
  0x17   : > { %684 = vmatpush3.bf16.msra.mxu0 %v736_v7  ;;  %v406_v40 = vsel %vm403_vm2, %v404_v37, %v405_v39 }
  0x18   : > { %685 = vmatprep.subr.bf16.mxu0 %v767_v1  ;;  %v196_v27 = vor.u32 %v195_v23, %v191_v22 }
  0x19   : > { %664 = vmatpush3.bf16.msra.mxu1 %v750_v14 }
  0x1a   : > { %665 = vmatprep.subr.bf16.mxu1 %v767_v1  ;;  %v201_v30 = vsel %vm189_vm1, %v196_v27, %v200_v28 }
  0x1b   : > { %686 = vmatpush3.bf16.msra.mxu0 %v737_v9 }
  0x1c   : > { %687 = vmatprep.subr.bf16.mxu0 %v767_v1 }
  0x1d   : > { %666 = vmatpush3.bf16.msra.mxu1 %v752_v18 }
  0x1e   : > { %667 = vmatprep.subr.bf16.mxu1 %v767_v1 }
  0x1f   : > { %688 = vmatpush3.bf16.msra.mxu0 %v738_v11 }
  0x20   : > { %689 = vmatprep.subr.bf16.mxu0 %v767_v1 }
  0x21   : > { %668 = vmatpush3.bf16.msra.mxu1 %v754_v21 }
  0x22   : > { %669 = vmatprep.subr.bf16.mxu1 %v767_v1 }
  0x23   : > { %690 = vmatpush3.bf16.msra.mxu0 %v739_v16 }
  0x24   : > { %695 = vmatprep.subr.bf16.mxu0 %v767_v1 }
  0x25   : > { %670 = vmatpush3.bf16.msra.mxu1 %v756_v26 }
  0x26   : > { %692 = vmatmul.mubr.bf16.vlgmr.msra.gmra.mrb[0].mxu0 %v582_v15 }
  0x27   : > { %696 = vmatpush3.bf16.msra.mxu0 %v743_v20  ;;  %711 = vmatprep.mubr.msk.bf16.mxu0 %vm768_vm0, %v767_v1 }
  0x28   : > { %697 = vmatprep.subr.bf16.mxu0 %v767_v1  ;;  %672 = vmatmul.mubr.bf16.vlgmr.msra.gmra.mrb[0].mxu1 %v201_v30 }
  0x2b   : > { %698 = vmatpush3.bf16.msra.mxu0 %v745_v25 }
  0x2c   : > { %699 = vmatprep.subr.bf16.mxu0 %v767_v1 }
  0x2f   : > { %700 = vmatpush3.bf16.msra.mxu0 %v747_v29 }
  0x30   : > { %701 = vmatprep.subr.bf16.mxu0 %v767_v1 }
  0x33   : > { %702 = vmatpush3.bf16.msra.mxu0 %v749_v31 }
  0x34   : > { %703 = vmatprep.subr.bf16.mxu0 %v767_v1 }
  0x37   : > { %704 = vmatpush3.bf16.msra.mxu0 %v751_v32 }
  0x38   : > { %705 = vmatprep.subr.bf16.mxu0 %v767_v1 }
  0x3b   : > { %706 = vmatpush3.bf16.msra.mxu0 %v753_v33 }
  0x3c   : > { %707 = vmatprep.subr.bf16.mxu0 %v767_v1 }
  0x3f   : > { %708 = vmatpush3.bf16.msra.mxu0 %v755_v36 }
  0x40   : > { %709 = vmatprep.subr.bf16.mxu0 %v767_v1 }
  0x43   : > { %710 = vmatpush3.bf16.msra.mxu0 %v758_v38 }
  0x46   : > { %712 = vmatmul.mubr.bf16.vlgmr.msra.gmra.mrb[0].mxu0 %v406_v40 }
  0xfb   : > { %v285_v41 = vpop.f32.mrb[0].mxu1 }
  0xfc   : > { %v673_v42 = vpop.f32.mrb[1].mxu1 }
  0xfd   : > { %v288_v43 = vpop.f32.mrb[2].mxu1 }
  0xfe   : > { %v674_v44 = vpop.f32.mrb[3].mxu1 }
 0x119   : > { %v490_v45 = vpop.f32.mrb[0].mxu0 }
 0x11a   : > { %v715_v46 = vadd.f32 %v490_v45, %v285_v41  ;;  %v713_v47 = vpop.f32.mrb[1].mxu0 }
 0x11b   : > { %v493_v48 = vpop.f32.mrb[2].mxu0 }
 0x11c   : > { %v499_v49 = vmax.f32 %v715_v46, 0.0  ;;  %v716_v50 = vadd.f32 %v493_v48, %v288_v43  ;;  %v714_v51 = vpop.f32.mrb[3].mxu0 }
 0x11e   : > { %501 = vst [vmem:[%s143_s14] sm:$0xff] %v499_v49  ;;  %v500_v52 = vmax.f32 %v716_v50, 0.0 }
 0x120   : > { %502 = vst [vmem:[%s143_s14 + $0x8] sm:$0xff] %v500_v52 }
 0x121 PF: > { %s12_s9 = sadd.s32 1, %s765_s9  }
 0x122   : > { %p9_p4 = scmp.ge.s32.totalorder %s12_s9, 4  }
 0x124   :  { %11 = sbr.rel (!%p9_p4) target bundleno = 1 (0x1), region = 60 }

</bundles_post_ra>
